<compile_context>
chip_gen: v7x
topology: tpu7x:2x2x1
jax: 0.10.0
libtpu: 0.0.40
codegen_flags: <defaults>
</compile_context>

<pallas_src>
import jax
import jax.numpy as jnp
from jax.experimental import pallas as pl
from jax.experimental.pallas import tpu as pltpu

_LANES = 128          # lane-dense last dim -> unmasked 128-lane stores
_SUBLANE_PAD = 32     # safe sublane multiple for f32 / bf16 / int8 packing
_MAX_TILE_ROWS = 512  # 512*128*4B = 256 KiB/block; 4 bufs << 32 MiB scoped VMEM
_SMALL_NUMEL = 1024   # below this a kernel is pure overhead -> return directly


def _copy_kernel(x_ref, o_ref):
    # Hot path: the entire forward pass is `return {'loss': loss}`.
    o_ref[...] = x_ref[...]


def _round_up(x, m):
    return ((x + m - 1) // m) * m


@jax.jit
def _pallas_identity_impl(x):
    """Identity on an arbitrary-shaped array via a row-tiled, lane-dense,
    input-aliased Pallas copy kernel."""
    orig_shape = x.shape
    n = x.size
    flat = x.reshape(n)

    # Lane-dense 2-D layout: (rows, 128), rows padded to a sublane multiple.
    rows_needed = pl.cdiv(n, _LANES)
    rows = _round_up(rows_needed, _SUBLANE_PAD)
    tile_rows = min(_MAX_TILE_ROWS, rows)
    n_pad = rows * _LANES
    if n_pad != n:
        flat = jnp.pad(flat, (0, n_pad - n))
    x2d = flat.reshape(rows, _LANES)

    out2d = pl.pallas_call(
        _copy_kernel,
        out_shape=jax.ShapeDtypeStruct((rows, _LANES), x2d.dtype),
        grid=(pl.cdiv(rows, tile_rows),),
        in_specs=[pl.BlockSpec((tile_rows, _LANES), lambda i: (i, 0))],
        out_specs=pl.BlockSpec((tile_rows, _LANES), lambda i: (i, 0)),
        # Output aliases the (padded) input buffer: no extra HBM allocation.
        input_output_aliases={0: 0},
        compiler_params=pltpu.CompilerParams(
            dimension_semantics=("parallel",)),
    )(x2d)

    return out2d.reshape(n_pad)[:n].reshape(orig_shape)


# pallas_call has no automatic VJP; the module's loss must be differentiable,
# so wrap the identity in a trivial custom_vjp (backward is also identity).
@jax.custom_vjp
def _pallas_identity(x):
    return _pallas_identity_impl(x)


def _pallas_identity_fwd(x):
    return _pallas_identity_impl(x), None


def _pallas_identity_bwd(_, g):
    return (g,)


_pallas_identity.defvjp(_pallas_identity_fwd, _pallas_identity_bwd)


def model_provided_loss_forward(loss=None, force_pallas=False, **kwargs):
    """JAX/Pallas equivalent of Loss.forward: returns {'loss': loss}.

    Scalars / tiny or empty losses are returned directly (zero-cost, exact
    semantics, autodiff-safe).  Larger per-element loss tensors — or any loss
    when force_pallas=True — are routed through the Pallas identity kernel.
    """
    if loss is None:
        # TODO(synk): PyTorch logs via logger.exception and still returns
        # {'loss': None}; we raise instead since None cannot flow through JAX.
        raise ValueError(
            "ModelProvidedLoss expects key 'loss' in model's returned "
            "dictionary. The model is supposed to calculate the loss itself "
            "in its forward function."
        )

    loss = jnp.asarray(loss)

    # Zero-size edge case: nothing to copy, and Mosaic rejects 0-size blocks.
    if loss.size == 0:
        return {"loss": loss}

    # Fast path (recommended): a pass-through has no compute to hide.
    if not force_pallas and loss.size <= _SMALL_NUMEL:
        return {"loss": loss}

    return {"loss": _pallas_identity(loss)}


if __name__ == "__main__":
    key = jax.random.PRNGKey(0)

    # Common case: the model returns a scalar loss (e.g. Latent_ODE ELBO).
    per_sample = jax.random.uniform(key, (2, 8), dtype=jnp.float32)
    scalar_loss = jnp.mean(per_sample)
    res_scalar = model_provided_loss_forward(loss=scalar_loss)
    jax.block_until_ready(res_scalar["loss"])
    assert res_scalar["loss"].shape == scalar_loss.shape
    assert res_scalar["loss"].dtype == scalar_loss.dtype
    assert bool(jnp.allclose(res_scalar["loss"], scalar_loss))

    # Per-token loss tensor routed through the Pallas identity kernel once.
    per_token = jax.random.uniform(jax.random.PRNGKey(0), (8, 32),
                                   dtype=jnp.float32)
    res_pallas = model_provided_loss_forward(loss=per_token, force_pallas=True)
    jax.block_until_ready(res_pallas["loss"])
    assert res_pallas["loss"].shape == per_token.shape
    assert res_pallas["loss"].dtype == per_token.dtype
    assert bool(jnp.allclose(res_pallas["loss"], per_token))

    # Autodiff through the Pallas path must behave as an exact identity.
    g = jax.grad(lambda x: jnp.sum(
        model_provided_loss_forward(loss=x, force_pallas=True)["loss"]))(per_token)
    jax.block_until_ready(g)
    assert bool(jnp.allclose(g, jnp.ones_like(per_token)))

    print("KERNEL_OK")
</pallas_src>

<mosaic_0001>
module attributes {stable_mosaic.version = 11 : i64} {
  func.func @_copy_kernel(%arg0: i32, %arg1: memref<32x128xf32, #tpu.memory_space<vmem>>, %arg2: memref<32x128xf32, #tpu.memory_space<vmem>>) attributes {dimension_semantics = [#tpu.dimension_semantics<parallel>], iteration_bounds = array<i64: 1>, scalar_prefetch = 0 : i64, scratch_operands = 0 : i64, tpu.core_type = #tpu.core_type<tc>, window_params = [{transform_indices = @transform_0, window_bounds = array<i64: 32, 128>}, {transform_indices = @transform_1, window_bounds = array<i64: 32, 128>}]} {
    %c0 = arith.constant 0 : index
    %c0_0 = arith.constant 0 : index
    %0 = vector.load %arg1[%c0, %c0_0] : memref<32x128xf32, #tpu.memory_space<vmem>>, vector<32x128xf32>
    %c0_1 = arith.constant 0 : index
    %c0_2 = arith.constant 0 : index
    %1 = vector.load %arg2[%c0_1, %c0_2] : memref<32x128xf32, #tpu.memory_space<vmem>>, vector<32x128xf32>
    tpu.vector_store %arg2[%c0_1, %c0_2], %0 {strides = array<i32>} : memref<32x128xf32, #tpu.memory_space<vmem>>, vector<32x128xf32>,
    return
  }
  func.func @transform_0(%arg0: i32) -> (i32, i32) {
    %c0_i32 = arith.constant 0 : i32
    %c0_i32_0 = arith.constant 0 : i32
    return %arg0, %c0_i32 : i32, i32
  }
  func.func @transform_1(%arg0: i32) -> (i32, i32) {
    %c0_i32 = arith.constant 0 : i32
    %c0_i32_0 = arith.constant 0 : i32
    return %arg0, %c0_i32 : i32, i32
  }
}

</mosaic_0001>

<bundles_post_ra>
// kernel: _pallas_identity_impl.1
= control target key start
LH: loop header
LB: loop body
LE: loop exit
PB: predicated region body
PF: predicated region fallthrough
CT: control target
= control target key end

     0   :  { %s54_s0 = inlined_call_operand.vmem [shape: f32[32,128], index: 0, kind: input, shape index: {}, may-alias: {0,1}]   ;;  %s55_s1 = inlined_call_operand.vmem [shape: f32[32,128], index: 1, kind: output, shape index: {}, may-alias: {0,1}]  }
   0x1   :  { %v8_v0 = vld [vmem:[%s54_s0] sm:$0xff]  ;;  %v9_v1 = vld [vmem:[%s54_s0 + $0x8] sm:$0xff]  ;;  %v10_v2 = vld [vmem:[%s54_s0 + $0x10] sm:$0xff] }
   0x2   :  { %12 = vst [vmem:[%s55_s1] sm:$0xff] %v8_v0  ;;  %13 = vst [vmem:[%s55_s1 + $0x8] sm:$0xff] %v9_v1 }
   0x3   :  { %14 = vst [vmem:[%s55_s1 + $0x10] sm:$0xff] %v10_v2 }
   0xa   :  { %v11_v3 = vld [vmem:[%s54_s0 + $0x18] sm:$0xff] }
   0xb   :  { %15 = vst [vmem:[%s55_s1 + $0x18] sm:$0xff] %v11_v3 }

</bundles_post_ra>
